<compile_context>
chip_gen: v7x
topology: tpu7x:2x2x1
jax: 0.10.0
libtpu: 0.0.40
codegen_flags: <defaults>
</compile_context>

<pallas_src>
import jax
import jax.numpy as jnp
from jax import lax
from jax.experimental import pallas as pl
from jax.experimental.pallas import tpu as pltpu


def _make_lstm_kernel(T, B_pad, D, H):
    H4 = 4 * H

    def kernel(x_ref, wih_ref, whh_ref, b_ref, h_ref, c_ref, xproj_ref):
        # x_ref    : (T*B_pad, D)   bf16, time-major, batch padded to B_pad
        # wih_ref  : (D, 4H)        bf16
        # whh_ref  : (H, 4H)        bf16
        # b_ref    : (1, 4H)        f32  (b_ih + b_hh)
        # h_ref    : (B_pad, H)     f32 output (final hidden state)
        # c_ref    : (B_pad, H)     f32 output (final cell state)
        # xproj_ref: (T*B_pad, 4H)  f32 VMEM scratch (input projections)

        # ---- input projection for ALL timesteps at once (M = T*B_pad) ------
        xproj_ref[...] = (
            jnp.dot(x_ref[...], wih_ref[...],
                    preferred_element_type=jnp.float32)
            + b_ref[...]
        )

        # Hoist the (tiny) recurrent weight load out of the loop.
        whh = whh_ref[...]

        # ---- recurrence over time (state carried in vregs) -----------------
        def step(t, carry):
            h, c = carry
            start = pl.multiple_of(t * B_pad, B_pad)
            gx = xproj_ref[pl.ds(start, B_pad), :]                  # (B_pad, 4H)
            gates = gx + jnp.dot(h.astype(jnp.bfloat16), whh,
                                 preferred_element_type=jnp.float32)
            # Sigmoid once on the full lane-dense 4H-wide vector, then slice.
            g_sig = jax.nn.sigmoid(gates)
            i_g = g_sig[:, 0 * H:1 * H]
            f_g = g_sig[:, 1 * H:2 * H]
            o_g = g_sig[:, 3 * H:4 * H]
            g_g = jnp.tanh(gates[:, 2 * H:3 * H])
            c_new = f_g * c + i_g * g_g
            h_new = o_g * jnp.tanh(c_new)
            return (h_new, c_new)

        h0 = jnp.zeros((B_pad, H), jnp.float32)   # init_hidden
        c0 = jnp.zeros((B_pad, H), jnp.float32)   # init_C0
        h_fin, c_fin = lax.fori_loop(0, T, step, (h0, c0), unroll=True)

        h_ref[...] = h_fin
        c_ref[...] = c_fin

    return kernel


@jax.jit
def encoder_pallas(feature, w_ih, w_hh, b_ih, b_hh):
    """feature: (B, T, D). Weights in PyTorch nn.LSTM layout:
    w_ih (4H, D), w_hh (4H, H), b_ih (4H,), b_hh (4H,), gate order (i, f, g, o).
    Returns (h_n, c_n), each (1, B, H) — like the Encoder module."""
    B, T, D = feature.shape
    H4, _ = w_ih.shape
    H = H4 // 4
    B_pad = ((B + 7) // 8) * 8  # sublane-align the batch

    # Layout prep (tiny wrapper ops): time-major, batch padded, flattened so
    # each timestep's rows are contiguous and 8-aligned; bf16 for MXU / DMA.
    x_t = jnp.transpose(feature, (1, 0, 2))                       # (T, B, D)
    x_t = jnp.pad(x_t, ((0, 0), (0, B_pad - B), (0, 0)))          # (T, B_pad, D)
    x2d = x_t.reshape(T * B_pad, D).astype(jnp.bfloat16)

    wih_t = jnp.transpose(w_ih).astype(jnp.bfloat16)              # (D, 4H)
    whh_t = jnp.transpose(w_hh).astype(jnp.bfloat16)              # (H, 4H)
    b = (b_ih + b_hh).reshape(1, H4).astype(jnp.float32)

    h, c = pl.pallas_call(
        _make_lstm_kernel(T, B_pad, D, H),
        out_shape=(jax.ShapeDtypeStruct((B_pad, H), jnp.float32),
                   jax.ShapeDtypeStruct((B_pad, H), jnp.float32)),
        grid_spec=pltpu.PrefetchScalarGridSpec(
            num_scalar_prefetch=0,
            grid=(1,),
            in_specs=[
                pl.BlockSpec((T * B_pad, D), lambda i: (0, 0)),
                pl.BlockSpec((D, H4), lambda i: (0, 0)),
                pl.BlockSpec((H, H4), lambda i: (0, 0)),
                pl.BlockSpec((1, H4), lambda i: (0, 0)),
            ],
            out_specs=[
                pl.BlockSpec((B_pad, H), lambda i: (0, 0)),
                pl.BlockSpec((B_pad, H), lambda i: (0, 0)),
            ],
            scratch_shapes=[pltpu.VMEM((T * B_pad, H4), jnp.float32)],
        ),
        compiler_params=pltpu.CompilerParams(
            dimension_semantics=("arbitrary",)),
    )(x2d, wih_t, whh_t, b)

    h = h[:B]
    c = c[:B]
    return h[None], c[None]  # (n_layers=1, B, H) each, like PyTorch LSTM


def encoder_ref(feature, w_ih, w_hh, b_ih, b_hh):
    """Pure-JAX f32 reference matching PyTorch nn.LSTM semantics."""
    B, T, D = feature.shape
    H = w_hh.shape[1]
    h0 = jnp.zeros((B, H), jnp.float32)
    c0 = jnp.zeros((B, H), jnp.float32)

    def step(carry, x_t):
        h, c = carry
        gates = x_t @ w_ih.T + b_ih + h @ w_hh.T + b_hh
        i = jax.nn.sigmoid(gates[:, 0 * H:1 * H])
        f = jax.nn.sigmoid(gates[:, 1 * H:2 * H])
        g = jnp.tanh(gates[:, 2 * H:3 * H])
        o = jax.nn.sigmoid(gates[:, 3 * H:4 * H])
        c = f * c + i * g
        h = o * jnp.tanh(c)
        return (h, c), None

    (h, c), _ = lax.scan(step, (h0, c0), jnp.transpose(feature, (1, 0, 2)))
    return h[None], c[None]


if __name__ == "__main__":
    # Small shapes implied by the module: batch=2, seq=8, input_size=16, hidden=32.
    B, T, D, H = 2, 8, 16, 32
    key = jax.random.PRNGKey(0)
    kx, k1, k2, k3, k4 = jax.random.split(key, 5)

    feature = jax.random.normal(kx, (B, T, D), dtype=jnp.float32)
    s = 1.0 / jnp.sqrt(H)  # PyTorch LSTM init scale
    w_ih = s * jax.random.normal(k1, (4 * H, D), dtype=jnp.float32)
    w_hh = s * jax.random.normal(k2, (4 * H, H), dtype=jnp.float32)
    b_ih = s * jax.random.normal(k3, (4 * H,), dtype=jnp.float32)
    b_hh = s * jax.random.normal(k4, (4 * H,), dtype=jnp.float32)

    h, c = encoder_pallas(feature, w_ih, w_hh, b_ih, b_hh)
    h = jax.block_until_ready(h)
    c = jax.block_until_ready(c)

    h_ref, c_ref = encoder_ref(feature, w_ih, w_hh, b_ih, b_hh)
    assert h.shape == (1, B, H) and c.shape == (1, B, H)
    # bf16 MXU operands (f32 accumulation) -> slightly looser tolerance.
    assert jnp.allclose(h, h_ref, atol=3e-2, rtol=3e-2), "hidden mismatch vs reference"
    assert jnp.allclose(c, c_ref, atol=3e-2, rtol=3e-2), "cell mismatch vs reference"

    print("KERNEL_OK")
</pallas_src>

<mosaic_0001>
module attributes {stable_mosaic.version = 11 : i64} {
  func.func @kernel(%arg0: i32, %arg1: memref<64x16xbf16, #tpu.memory_space<vmem>>, %arg2: memref<16x128xbf16, #tpu.memory_space<vmem>>, %arg3: memref<32x128xbf16, #tpu.memory_space<vmem>>, %arg4: memref<1x128xf32, #tpu.memory_space<vmem>>, %arg5: memref<8x32xf32, #tpu.memory_space<vmem>>, %arg6: memref<8x32xf32, #tpu.memory_space<vmem>>, %arg7: memref<64x128xf32, #tpu.memory_space<vmem>>) attributes {dimension_semantics = [#tpu.dimension_semantics<arbitrary>], iteration_bounds = array<i64: 1>, scalar_prefetch = 0 : i64, scratch_operands = 1 : i64, tpu.core_type = #tpu.core_type<tc>, window_params = [{pipeline_mode = #tpu.pipeline_mode<synchronous>, transform_indices = @transform_0, window_bounds = array<i64: 64, 16>}, {pipeline_mode = #tpu.pipeline_mode<synchronous>, transform_indices = @transform_1, window_bounds = array<i64: 16, 128>}, {pipeline_mode = #tpu.pipeline_mode<synchronous>, transform_indices = @transform_2, window_bounds = array<i64: 32, 128>}, {pipeline_mode = #tpu.pipeline_mode<synchronous>, transform_indices = @transform_3, window_bounds = array<i64: 1, 128>}, {pipeline_mode = #tpu.pipeline_mode<synchronous>, transform_indices = @transform_4, window_bounds = array<i64: 8, 32>}, {pipeline_mode = #tpu.pipeline_mode<synchronous>, transform_indices = @transform_5, window_bounds = array<i64: 8, 32>}]} {
    %c0 = arith.constant 0 : index
    %c0_0 = arith.constant 0 : index
    %0 = vector.load %arg1[%c0, %c0_0] : memref<64x16xbf16, #tpu.memory_space<vmem>>, vector<64x16xbf16>
    %c0_1 = arith.constant 0 : index
    %c0_2 = arith.constant 0 : index
    %1 = vector.load %arg2[%c0_1, %c0_2] : memref<16x128xbf16, #tpu.memory_space<vmem>>, vector<16x128xbf16>
    %cst = arith.constant dense<0.000000e+00> : vector<64x128xf32>
    %2 = tpu.matmul %0, %1, %cst {dimension_numbers = #tpu.dot_dimension_numbers<[1], [0], [0], [1], [0, 0, 1, 1], [], []>} : vector<64x16xbf16>, vector<16x128xbf16>, vector<64x128xf32> -> vector<64x128xf32>
    %c0_3 = arith.constant 0 : index
    %c0_4 = arith.constant 0 : index
    %3 = vector.load %arg4[%c0_3, %c0_4] : memref<1x128xf32, #tpu.memory_space<vmem>>, vector<1x128xf32>
    %4 = vector.broadcast %3 : vector<1x128xf32> to vector<64x128xf32>
    %5 = arith.addf %2, %4 : vector<64x128xf32>
    %c0_5 = arith.constant 0 : index
    %c0_6 = arith.constant 0 : index
    %6 = vector.load %arg7[%c0_5, %c0_6] : memref<64x128xf32, #tpu.memory_space<vmem>>, vector<64x128xf32>
    tpu.vector_store %arg7[%c0_5, %c0_6], %5 {strides = array<i32>} : memref<64x128xf32, #tpu.memory_space<vmem>>, vector<64x128xf32>,
    %c0_7 = arith.constant 0 : index
    %c0_8 = arith.constant 0 : index
    %7 = vector.load %arg3[%c0_7, %c0_8] : memref<32x128xbf16, #tpu.memory_space<vmem>>, vector<32x128xbf16>
    %cst_9 = arith.constant 0.000000e+00 : f32
    %8 = vector.broadcast %cst_9 : f32 to vector<8x32xf32>
    %cst_10 = arith.constant 0.000000e+00 : f32
    %9 = vector.broadcast %cst_10 : f32 to vector<8x32xf32>
    %c0_i32 = arith.constant 0 : i32
    %c8_i32 = arith.constant 8 : i32
    %10 = arith.muli %c0_i32, %c8_i32 : i32
    %11 = tpu.assume_multiple %10, 8 : i32
    %12 = arith.index_cast %11 : i32 to index
    %c0_11 = arith.constant 0 : index
    %13 = vector.load %arg7[%12, %c0_11] : memref<64x128xf32, #tpu.memory_space<vmem>>, vector<8x128xf32>
    %14 = arith.truncf %8 : vector<8x32xf32> to vector<8x32xbf16>
    %cst_12 = arith.constant dense<0.000000e+00> : vector<8x128xf32>
    %15 = tpu.matmul %14, %7, %cst_12 {dimension_numbers = #tpu.dot_dimension_numbers<[1], [0], [0], [1], [0, 0, 1, 1], [], []>} : vector<8x32xbf16>, vector<32x128xbf16>, vector<8x128xf32> -> vector<8x128xf32>
    %16 = arith.addf %13, %15 : vector<8x128xf32>
    %17 = arith.negf %16 : vector<8x128xf32>
    %18 = math.exp %17 : vector<8x128xf32>
    %cst_13 = arith.constant 1.000000e+00 : f32
    %19 = vector.broadcast %cst_13 : f32 to vector<8x128xf32>
    %20 = arith.addf %19, %18 : vector<8x128xf32>
    %21 = arith.divf %19, %20 : vector<8x128xf32>
    %22 = vector.extract_strided_slice %21 {offsets = [0, 0], sizes = [8, 32], strides = [1, 1]} : vector<8x128xf32> to vector<8x32xf32>
    %23 = vector.extract_strided_slice %21 {offsets = [0, 32], sizes = [8, 32], strides = [1, 1]} : vector<8x128xf32> to vector<8x32xf32>
    %24 = vector.extract_strided_slice %21 {offsets = [0, 96], sizes = [8, 32], strides = [1, 1]} : vector<8x128xf32> to vector<8x32xf32>
    %25 = vector.extract_strided_slice %16 {offsets = [0, 64], sizes = [8, 32], strides = [1, 1]} : vector<8x128xf32> to vector<8x32xf32>
    %26 = math.tanh %25 : vector<8x32xf32>
    %27 = arith.mulf %23, %9 : vector<8x32xf32>
    %28 = arith.mulf %22, %26 : vector<8x32xf32>
    %29 = arith.addf %27, %28 : vector<8x32xf32>
    %30 = math.tanh %29 : vector<8x32xf32>
    %31 = arith.mulf %24, %30 : vector<8x32xf32>
    %c1_i32 = arith.constant 1 : i32
    %c8_i32_14 = arith.constant 8 : i32
    %32 = arith.muli %c1_i32, %c8_i32_14 : i32
    %33 = tpu.assume_multiple %32, 8 : i32
    %34 = arith.index_cast %33 : i32 to index
    %c0_15 = arith.constant 0 : index
    %35 = vector.load %arg7[%34, %c0_15] : memref<64x128xf32, #tpu.memory_space<vmem>>, vector<8x128xf32>
    %36 = arith.truncf %31 : vector<8x32xf32> to vector<8x32xbf16>
    %cst_16 = arith.constant dense<0.000000e+00> : vector<8x128xf32>
    %37 = tpu.matmul %36, %7, %cst_16 {dimension_numbers = #tpu.dot_dimension_numbers<[1], [0], [0], [1], [0, 0, 1, 1], [], []>} : vector<8x32xbf16>, vector<32x128xbf16>, vector<8x128xf32> -> vector<8x128xf32>
    %38 = arith.addf %35, %37 : vector<8x128xf32>
    %39 = arith.negf %38 : vector<8x128xf32>
    %40 = math.exp %39 : vector<8x128xf32>
    %cst_17 = arith.constant 1.000000e+00 : f32
    %41 = vector.broadcast %cst_17 : f32 to vector<8x128xf32>
    %42 = arith.addf %41, %40 : vector<8x128xf32>
    %43 = arith.divf %41, %42 : vector<8x128xf32>
    %44 = vector.extract_strided_slice %43 {offsets = [0, 0], sizes = [8, 32], strides = [1, 1]} : vector<8x128xf32> to vector<8x32xf32>
    %45 = vector.extract_strided_slice %43 {offsets = [0, 32], sizes = [8, 32], strides = [1, 1]} : vector<8x128xf32> to vector<8x32xf32>
    %46 = vector.extract_strided_slice %43 {offsets = [0, 96], sizes = [8, 32], strides = [1, 1]} : vector<8x128xf32> to vector<8x32xf32>
    %47 = vector.extract_strided_slice %38 {offsets = [0, 64], sizes = [8, 32], strides = [1, 1]} : vector<8x128xf32> to vector<8x32xf32>
    %48 = math.tanh %47 : vector<8x32xf32>
    %49 = arith.mulf %45, %29 : vector<8x32xf32>
    %50 = arith.mulf %44, %48 : vector<8x32xf32>
    %51 = arith.addf %49, %50 : vector<8x32xf32>
    %52 = math.tanh %51 : vector<8x32xf32>
    %53 = arith.mulf %46, %52 : vector<8x32xf32>
    %c2_i32 = arith.constant 2 : i32
    %c8_i32_18 = arith.constant 8 : i32
    %54 = arith.muli %c2_i32, %c8_i32_18 : i32
    %55 = tpu.assume_multiple %54, 8 : i32
    %56 = arith.index_cast %55 : i32 to index
    %c0_19 = arith.constant 0 : index
    %57 = vector.load %arg7[%56, %c0_19] : memref<64x128xf32, #tpu.memory_space<vmem>>, vector<8x128xf32>
    %58 = arith.truncf %53 : vector<8x32xf32> to vector<8x32xbf16>
    %cst_20 = arith.constant dense<0.000000e+00> : vector<8x128xf32>
    %59 = tpu.matmul %58, %7, %cst_20 {dimension_numbers = #tpu.dot_dimension_numbers<[1], [0], [0], [1], [0, 0, 1, 1], [], []>} : vector<8x32xbf16>, vector<32x128xbf16>, vector<8x128xf32> -> vector<8x128xf32>
    %60 = arith.addf %57, %59 : vector<8x128xf32>
    %61 = arith.negf %60 : vector<8x128xf32>
    %62 = math.exp %61 : vector<8x128xf32>
    %cst_21 = arith.constant 1.000000e+00 : f32
    %63 = vector.broadcast %cst_21 : f32 to vector<8x128xf32>
    %64 = arith.addf %63, %62 : vector<8x128xf32>
    %65 = arith.divf %63, %64 : vector<8x128xf32>
    %66 = vector.extract_strided_slice %65 {offsets = [0, 0], sizes = [8, 32], strides = [1, 1]} : vector<8x128xf32> to vector<8x32xf32>
    %67 = vector.extract_strided_slice %65 {offsets = [0, 32], sizes = [8, 32], strides = [1, 1]} : vector<8x128xf32> to vector<8x32xf32>
    %68 = vector.extract_strided_slice %65 {offsets = [0, 96], sizes = [8, 32], strides = [1, 1]} : vector<8x128xf32> to vector<8x32xf32>
    %69 = vector.extract_strided_slice %60 {offsets = [0, 64], sizes = [8, 32], strides = [1, 1]} : vector<8x128xf32> to vector<8x32xf32>
    %70 = math.tanh %69 : vector<8x32xf32>
    %71 = arith.mulf %67, %51 : vector<8x32xf32>
    %72 = arith.mulf %66, %70 : vector<8x32xf32>
    %73 = arith.addf %71, %72 : vector<8x32xf32>
    %74 = math.tanh %73 : vector<8x32xf32>
    %75 = arith.mulf %68, %74 : vector<8x32xf32>
    %c3_i32 = arith.constant 3 : i32
    %c8_i32_22 = arith.constant 8 : i32
    %76 = arith.muli %c3_i32, %c8_i32_22 : i32
    %77 = tpu.assume_multiple %76, 8 : i32
    %78 = arith.index_cast %77 : i32 to index
    %c0_23 = arith.constant 0 : index
    %79 = vector.load %arg7[%78, %c0_23] : memref<64x128xf32, #tpu.memory_space<vmem>>, vector<8x128xf32>
    %80 = arith.truncf %75 : vector<8x32xf32> to vector<8x32xbf16>
    %cst_24 = arith.constant dense<0.000000e+00> : vector<8x128xf32>
    %81 = tpu.matmul %80, %7, %cst_24 {dimension_numbers = #tpu.dot_dimension_numbers<[1], [0], [0], [1], [0, 0, 1, 1], [], []>} : vector<8x32xbf16>, vector<32x128xbf16>, vector<8x128xf32> -> vector<8x128xf32>
    %82 = arith.addf %79, %81 : vector<8x128xf32>
    %83 = arith.negf %82 : vector<8x128xf32>
    %84 = math.exp %83 : vector<8x128xf32>
    %cst_25 = arith.constant 1.000000e+00 : f32
    %85 = vector.broadcast %cst_25 : f32 to vector<8x128xf32>
    %86 = arith.addf %85, %84 : vector<8x128xf32>
    %87 = arith.divf %85, %86 : vector<8x128xf32>
    %88 = vector.extract_strided_slice %87 {offsets = [0, 0], sizes = [8, 32], strides = [1, 1]} : vector<8x128xf32> to vector<8x32xf32>
    %89 = vector.extract_strided_slice %87 {offsets = [0, 32], sizes = [8, 32], strides = [1, 1]} : vector<8x128xf32> to vector<8x32xf32>
    %90 = vector.extract_strided_slice %87 {offsets = [0, 96], sizes = [8, 32], strides = [1, 1]} : vector<8x128xf32> to vector<8x32xf32>
    %91 = vector.extract_strided_slice %82 {offsets = [0, 64], sizes = [8, 32], strides = [1, 1]} : vector<8x128xf32> to vector<8x32xf32>
    %92 = math.tanh %91 : vector<8x32xf32>
    %93 = arith.mulf %89, %73 : vector<8x32xf32>
    %94 = arith.mulf %88, %92 : vector<8x32xf32>
    %95 = arith.addf %93, %94 : vector<8x32xf32>
    %96 = math.tanh %95 : vector<8x32xf32>
    %97 = arith.mulf %90, %96 : vector<8x32xf32>
    %c4_i32 = arith.constant 4 : i32
    %c8_i32_26 = arith.constant 8 : i32
    %98 = arith.muli %c4_i32, %c8_i32_26 : i32
    %99 = tpu.assume_multiple %98, 8 : i32
    %100 = arith.index_cast %99 : i32 to index
    %c0_27 = arith.constant 0 : index
    %101 = vector.load %arg7[%100, %c0_27] : memref<64x128xf32, #tpu.memory_space<vmem>>, vector<8x128xf32>
    %102 = arith.truncf %97 : vector<8x32xf32> to vector<8x32xbf16>
    %cst_28 = arith.constant dense<0.000000e+00> : vector<8x128xf32>
    %103 = tpu.matmul %102, %7, %cst_28 {dimension_numbers = #tpu.dot_dimension_numbers<[1], [0], [0], [1], [0, 0, 1, 1], [], []>} : vector<8x32xbf16>, vector<32x128xbf16>, vector<8x128xf32> -> vector<8x128xf32>
    %104 = arith.addf %101, %103 : vector<8x128xf32>
    %105 = arith.negf %104 : vector<8x128xf32>
    %106 = math.exp %105 : vector<8x128xf32>
    %cst_29 = arith.constant 1.000000e+00 : f32
    %107 = vector.broadcast %cst_29 : f32 to vector<8x128xf32>
    %108 = arith.addf %107, %106 : vector<8x128xf32>
    %109 = arith.divf %107, %108 : vector<8x128xf32>
    %110 = vector.extract_strided_slice %109 {offsets = [0, 0], sizes = [8, 32], strides = [1, 1]} : vector<8x128xf32> to vector<8x32xf32>
    %111 = vector.extract_strided_slice %109 {offsets = [0, 32], sizes = [8, 32], strides = [1, 1]} : vector<8x128xf32> to vector<8x32xf32>
    %112 = vector.extract_strided_slice %109 {offsets = [0, 96], sizes = [8, 32], strides = [1, 1]} : vector<8x128xf32> to vector<8x32xf32>
    %113 = vector.extract_strided_slice %104 {offsets = [0, 64], sizes = [8, 32], strides = [1, 1]} : vector<8x128xf32> to vector<8x32xf32>
    %114 = math.tanh %113 : vector<8x32xf32>
    %115 = arith.mulf %111, %95 : vector<8x32xf32>
    %116 = arith.mulf %110, %114 : vector<8x32xf32>
    %117 = arith.addf %115, %116 : vector<8x32xf32>
    %118 = math.tanh %117 : vector<8x32xf32>
    %119 = arith.mulf %112, %118 : vector<8x32xf32>
    %c5_i32 = arith.constant 5 : i32
    %c8_i32_30 = arith.constant 8 : i32
    %120 = arith.muli %c5_i32, %c8_i32_30 : i32
    %121 = tpu.assume_multiple %120, 8 : i32
    %122 = arith.index_cast %121 : i32 to index
    %c0_31 = arith.constant 0 : index
    %123 = vector.load %arg7[%122, %c0_31] : memref<64x128xf32, #tpu.memory_space<vmem>>, vector<8x128xf32>
    %124 = arith.truncf %119 : vector<8x32xf32> to vector<8x32xbf16>
    %cst_32 = arith.constant dense<0.000000e+00> : vector<8x128xf32>
    %125 = tpu.matmul %124, %7, %cst_32 {dimension_numbers = #tpu.dot_dimension_numbers<[1], [0], [0], [1], [0, 0, 1, 1], [], []>} : vector<8x32xbf16>, vector<32x128xbf16>, vector<8x128xf32> -> vector<8x128xf32>
    %126 = arith.addf %123, %125 : vector<8x128xf32>
    %127 = arith.negf %126 : vector<8x128xf32>
    %128 = math.exp %127 : vector<8x128xf32>
    %cst_33 = arith.constant 1.000000e+00 : f32
    %129 = vector.broadcast %cst_33 : f32 to vector<8x128xf32>
    %130 = arith.addf %129, %128 : vector<8x128xf32>
    %131 = arith.divf %129, %130 : vector<8x128xf32>
    %132 = vector.extract_strided_slice %131 {offsets = [0, 0], sizes = [8, 32], strides = [1, 1]} : vector<8x128xf32> to vector<8x32xf32>
    %133 = vector.extract_strided_slice %131 {offsets = [0, 32], sizes = [8, 32], strides = [1, 1]} : vector<8x128xf32> to vector<8x32xf32>
    %134 = vector.extract_strided_slice %131 {offsets = [0, 96], sizes = [8, 32], strides = [1, 1]} : vector<8x128xf32> to vector<8x32xf32>
    %135 = vector.extract_strided_slice %126 {offsets = [0, 64], sizes = [8, 32], strides = [1, 1]} : vector<8x128xf32> to vector<8x32xf32>
    %136 = math.tanh %135 : vector<8x32xf32>
    %137 = arith.mulf %133, %117 : vector<8x32xf32>
    %138 = arith.mulf %132, %136 : vector<8x32xf32>
    %139 = arith.addf %137, %138 : vector<8x32xf32>
    %140 = math.tanh %139 : vector<8x32xf32>
    %141 = arith.mulf %134, %140 : vector<8x32xf32>
    %c6_i32 = arith.constant 6 : i32
    %c8_i32_34 = arith.constant 8 : i32
    %142 = arith.muli %c6_i32, %c8_i32_34 : i32
    %143 = tpu.assume_multiple %142, 8 : i32
    %144 = arith.index_cast %143 : i32 to index
    %c0_35 = arith.constant 0 : index
    %145 = vector.load %arg7[%144, %c0_35] : memref<64x128xf32, #tpu.memory_space<vmem>>, vector<8x128xf32>
    %146 = arith.truncf %141 : vector<8x32xf32> to vector<8x32xbf16>
    %cst_36 = arith.constant dense<0.000000e+00> : vector<8x128xf32>
    %147 = tpu.matmul %146, %7, %cst_36 {dimension_numbers = #tpu.dot_dimension_numbers<[1], [0], [0], [1], [0, 0, 1, 1], [], []>} : vector<8x32xbf16>, vector<32x128xbf16>, vector<8x128xf32> -> vector<8x128xf32>
    %148 = arith.addf %145, %147 : vector<8x128xf32>
    %149 = arith.negf %148 : vector<8x128xf32>
    %150 = math.exp %149 : vector<8x128xf32>
    %cst_37 = arith.constant 1.000000e+00 : f32
    %151 = vector.broadcast %cst_37 : f32 to vector<8x128xf32>
    %152 = arith.addf %151, %150 : vector<8x128xf32>
    %153 = arith.divf %151, %152 : vector<8x128xf32>
    %154 = vector.extract_strided_slice %153 {offsets = [0, 0], sizes = [8, 32], strides = [1, 1]} : vector<8x128xf32> to vector<8x32xf32>
    %155 = vector.extract_strided_slice %153 {offsets = [0, 32], sizes = [8, 32], strides = [1, 1]} : vector<8x128xf32> to vector<8x32xf32>
    %156 = vector.extract_strided_slice %153 {offsets = [0, 96], sizes = [8, 32], strides = [1, 1]} : vector<8x128xf32> to vector<8x32xf32>
    %157 = vector.extract_strided_slice %148 {offsets = [0, 64], sizes = [8, 32], strides = [1, 1]} : vector<8x128xf32> to vector<8x32xf32>
    %158 = math.tanh %157 : vector<8x32xf32>
    %159 = arith.mulf %155, %139 : vector<8x32xf32>
    %160 = arith.mulf %154, %158 : vector<8x32xf32>
    %161 = arith.addf %159, %160 : vector<8x32xf32>
    %162 = math.tanh %161 : vector<8x32xf32>
    %163 = arith.mulf %156, %162 : vector<8x32xf32>
    %c7_i32 = arith.constant 7 : i32
    %c8_i32_38 = arith.constant 8 : i32
    %164 = arith.muli %c7_i32, %c8_i32_38 : i32
    %165 = tpu.assume_multiple %164, 8 : i32
    %166 = arith.index_cast %165 : i32 to index
    %c0_39 = arith.constant 0 : index
    %167 = vector.load %arg7[%166, %c0_39] : memref<64x128xf32, #tpu.memory_space<vmem>>, vector<8x128xf32>
    %168 = arith.truncf %163 : vector<8x32xf32> to vector<8x32xbf16>
    %cst_40 = arith.constant dense<0.000000e+00> : vector<8x128xf32>
    %169 = tpu.matmul %168, %7, %cst_40 {dimension_numbers = #tpu.dot_dimension_numbers<[1], [0], [0], [1], [0, 0, 1, 1], [], []>} : vector<8x32xbf16>, vector<32x128xbf16>, vector<8x128xf32> -> vector<8x128xf32>
    %170 = arith.addf %167, %169 : vector<8x128xf32>
    %171 = arith.negf %170 : vector<8x128xf32>
    %172 = math.exp %171 : vector<8x128xf32>
    %cst_41 = arith.constant 1.000000e+00 : f32
    %173 = vector.broadcast %cst_41 : f32 to vector<8x128xf32>
    %174 = arith.addf %173, %172 : vector<8x128xf32>
    %175 = arith.divf %173, %174 : vector<8x128xf32>
    %176 = vector.extract_strided_slice %175 {offsets = [0, 0], sizes = [8, 32], strides = [1, 1]} : vector<8x128xf32> to vector<8x32xf32>
    %177 = vector.extract_strided_slice %175 {offsets = [0, 32], sizes = [8, 32], strides = [1, 1]} : vector<8x128xf32> to vector<8x32xf32>
    %178 = vector.extract_strided_slice %175 {offsets = [0, 96], sizes = [8, 32], strides = [1, 1]} : vector<8x128xf32> to vector<8x32xf32>
    %179 = vector.extract_strided_slice %170 {offsets = [0, 64], sizes = [8, 32], strides = [1, 1]} : vector<8x128xf32> to vector<8x32xf32>
    %180 = math.tanh %179 : vector<8x32xf32>
    %181 = arith.mulf %177, %161 : vector<8x32xf32>
    %182 = arith.mulf %176, %180 : vector<8x32xf32>
    %183 = arith.addf %181, %182 : vector<8x32xf32>
    %184 = math.tanh %183 : vector<8x32xf32>
    %185 = arith.mulf %178, %184 : vector<8x32xf32>
    %c8_i32_42 = arith.constant 8 : i32
    %c0_43 = arith.constant 0 : index
    %c0_44 = arith.constant 0 : index
    %186 = vector.load %arg5[%c0_43, %c0_44] : memref<8x32xf32, #tpu.memory_space<vmem>>, vector<8x32xf32>
    tpu.vector_store %arg5[%c0_43, %c0_44], %185 {strides = array<i32>} : memref<8x32xf32, #tpu.memory_space<vmem>>, vector<8x32xf32>,
    %c0_45 = arith.constant 0 : index
    %c0_46 = arith.constant 0 : index
    %187 = vector.load %arg6[%c0_45, %c0_46] : memref<8x32xf32, #tpu.memory_space<vmem>>, vector<8x32xf32>
    tpu.vector_store %arg6[%c0_45, %c0_46], %183 {strides = array<i32>} : memref<8x32xf32, #tpu.memory_space<vmem>>, vector<8x32xf32>,
    return
  }
  func.func @transform_0(%arg0: i32) -> (i32, i32) {
    %c0_i32 = arith.constant 0 : i32
    %c0_i32_0 = arith.constant 0 : i32
    %c0_i32_1 = arith.constant 0 : i32
    return %c0_i32, %c0_i32_0 : i32, i32
  }
  func.func @transform_1(%arg0: i32) -> (i32, i32) {
    %c0_i32 = arith.constant 0 : i32
    %c0_i32_0 = arith.constant 0 : i32
    %c0_i32_1 = arith.constant 0 : i32
    return %c0_i32, %c0_i32_0 : i32, i32
  }
  func.func @transform_2(%arg0: i32) -> (i32, i32) {
    %c0_i32 = arith.constant 0 : i32
    %c0_i32_0 = arith.constant 0 : i32
    %c0_i32_1 = arith.constant 0 : i32
    return %c0_i32, %c0_i32_0 : i32, i32
  }
  func.func @transform_3(%arg0: i32) -> (i32, i32) {
    %c0_i32 = arith.constant 0 : i32
    %c0_i32_0 = arith.constant 0 : i32
    %c0_i32_1 = arith.constant 0 : i32
    return %c0_i32, %c0_i32_0 : i32, i32
  }
  func.func @transform_4(%arg0: i32) -> (i32, i32) {
    %c0_i32 = arith.constant 0 : i32
    %c0_i32_0 = arith.constant 0 : i32
    %c0_i32_1 = arith.constant 0 : i32
    return %c0_i32, %c0_i32_0 : i32, i32
  }
  func.func @transform_5(%arg0: i32) -> (i32, i32) {
    %c0_i32 = arith.constant 0 : i32
    %c0_i32_0 = arith.constant 0 : i32
    %c0_i32_1 = arith.constant 0 : i32
    return %c0_i32, %c0_i32_0 : i32, i32
  }
}

</mosaic_0001>

<bundles_post_ra>
// kernel: encoder_pallas.1
= control target key start
LH: loop header
LB: loop body
LE: loop exit
PB: predicated region body
PF: predicated region fallthrough
CT: control target
= control target key end

     0   :  { %v978_v0 = vmov 0.0   ;;  %vm979_vm0 = vmmov 0   ;;  %vm63_vm1 = vcmask 130048   ;;  %v980_v6 = vmov 0   ;;  %s981_s28 = smov 64   ;;  %s1169_s1 = inlined_call_operand.vmem [shape: bf16[16,128], index: 1, kind: input, shape index: {}]   ;;  %s1170_s2 = inlined_call_operand.vmem [shape: bf16[32,128], index: 2, kind: input, shape index: {}]   ;;  %s1171_s0 = inlined_call_operand.vmem [shape: bf16[64,16], index: 0, kind: input, shape index: {}]   ;;  %s1172_s3 = inlined_call_operand.vmem [shape: f32[1,128], index: 3, kind: input, shape index: {}]   ;;  %s1173_s5 = inlined_call_operand.vmem [shape: f32[8,32], index: 5, kind: output, shape index: {1}]   ;;  %s1174_s4 = inlined_call_operand.vmem [shape: f32[8,32], index: 4, kind: output, shape index: {0}]  }
   0x1   :  { %837 = vmatprep.subr.bf16.mxu1 %v978_v0  ;;  %v907_v1 = vld [vmem:[%s1169_s1] sm:$0xff]   ;;  %841 = vmatprep.mubr.msk.bf16.mxu1 %vm979_vm0, %v978_v0  ;;  %v910_v4 = vld [vmem:[%s1171_s0 + $0x8] sm:$0xff]   ;;  %vm166_vm2 = vcmask 261120   ;;  %v912_v49 = vld [vmem:[%s1171_s0 + $0x10] sm:$0xff]  }
   0x2   :  { %v1023_v2 = vld [vmem:[%s1170_s2] sm:$0xff]   ;;  %827 = vmatprep.subr.bf16.mxu0 %v907_v1  ;;  %v1037_v5 = vld [vmem:[%s1170_s2 + $0x8] sm:$0xff]   ;;  %v913_v50 = vld [vmem:[%s1171_s0 + $0x18] sm:$0xff]  }
   0x3   :  { %v909_v3 = vld [vmem:[%s1171_s0] sm:$0xff]   ;;  %838 = vmatpush3.bf16.msra.mxu1 %v1023_v2  ;;  %828 = vmatpush3.bf16.msra.mxu0 %v907_v1  ;;  %s983_s0 = smov 96  }
   0x4   :  { %829 = vmatprep.mubr.msk.bf16.mxu0 %vm63_vm1, %v909_v3  ;;  %839 = vmatprep.subr.bf16.mxu1 %v978_v0  ;;  %v1056_v7 = vld [vmem:[%s1172_s3] ss:$0 sm:$0xff]  ;;  %s982_s3 = smov 32  }
   0x5   :  { %853 = vmatprep.subr.bf16.mxu0 %v978_v0 }
   0x6   :  { %830 = vmatmul.mubr.msk.bf16.vlgmr.msra.gmra.mrb[0].mxu0 %vm63_vm1, %v910_v4 }
   0x7   :  { %840 = vmatpush3.bf16.msra.mxu1 %v1037_v5  ;;  %854 = vmatpush3.bf16.msra.mxu0 %v1023_v2 }
   0x8   :  { %845 = vmatprep.subr.bf16.mxu1 %v978_v0  ;;  %855 = vmatprep.subr.bf16.mxu0 %v978_v0 }
   0x9   :  { %833 = vmatprep.mubr.msk.bf16.mxu0 %vm63_vm1, %v912_v49 }
   0xa   :  { %842 = vmatmul.mubr.bf16.vlgmr.msra.gmra.mrb[0].mxu1 %v980_v6 }
   0xb   :  { %846 = vmatpush3.bf16.msra.mxu1 %v1023_v2  ;;  %849 = vmatprep.mubr.msk.bf16.mxu1 %vm979_vm0, %v978_v0 }
   0xc   :  { %847 = vmatprep.subr.bf16.mxu1 %v978_v0  ;;  %856 = vmatpush3.bf16.msra.mxu0 %v1037_v5 }
   0xd   :  { %869 = vmatprep.subr.bf16.mxu0 %v978_v0 }
   0xe   :  { %834 = vmatmul.mubr.msk.bf16.gmra.mrb[4].mxu0 %vm63_vm1, %v913_v50 }
   0xf   :  { %848 = vmatpush3.bf16.msra.mxu1 %v1037_v5  ;;  %857 = vmatprep.mubr.msk.bf16.mxu0 %vm979_vm0, %v978_v0 }
  0x10   :  { %861 = vmatprep.subr.bf16.mxu1 %v978_v0 }
  0xd9   :  { %v1058_v8 = vpop.f32.mrb[0].mxu0 }
  0xda   :  { %v110_v9 = vpop.f32.mrb[1].mxu0  ;;  %v119_v60 = vadd.f32 %v1058_v8, %v1056_v7 }
  0xdb   :  { %v111_v10 = vadd.f32 %v1056_v7, %v110_v9  ;;  %v1061_v11 = vpop.f32.mrb[2].mxu0 }
  0xdc   :  { %v113_v12 = vpop.f32.mrb[3].mxu0 }
  0xdd   :  { %v204_v13 = vpop.f32.mrb[0].mxu1  ;;  %v114_v33 = vadd.f32 %v1056_v7, %v113_v12 }
  0xde   :  { %v210_v14 = vadd.f32 %v204_v13, %v111_v10  ;;  %v843_v15 = vpop.f32.mrb[1].mxu1 }
  0xdf   :  { %v207_v16 = vpop.f32.mrb[2].mxu1 }
  0xe0   :  { %914 = vtanh.f32 %v210_v14  ;;  %v844_v17 = vpop.f32.mrb[3].mxu1  ;;  %v783_v19 = vmul.f32 -1.442695, %v210_v14 }
  0xe1   :  { %v1089_v55 = vpop.f32.mrb[4].mxu0 }
  0xe2   :  { %916 = vpow2.f32 %v783_v19  ;;  %v1091_v56 = vpop.f32.mrb[5].mxu0 }
  0xe3   :  { %v1093_v57 = vpop.f32.mrb[6].mxu0 }
  0xe4   :  { %v1095_v58 = vpop.f32.mrb[7].mxu0 }
  0xea   :  { %v915_v18 = vpop.eup %914 }
  0xeb   :  { %220 = vrot.lane.b32.xlu0 %v915_v18, %s981_s28 }
  0xec   :  { %v917_v20 = vpop.eup %916 }
  0xed   :  { %v214_v21 = vadd.f32 1.0, %v917_v20 }
  0xef   :  { %918 = vrcp.f32 %v214_v21 }
  0xf9   :  { %v919_v22 = vpop.eup %918 }
  0xfa   :  { %v218_v25 = vmul.f32 0.0, %v919_v22 }
 0x15d   :  { %v221_v23 = vpop.permute.xlu0 %220 }
 0x15e   :  { %v223_v24 = vmul.f32 %v919_v22, %v221_v23 }
 0x160   :  { %225 = vrot.lane.b32.xlu0 %v223_v24, %s982_s3 }
 0x1d2   :  { %v226_v26 = vpop.permute.xlu0 %225 }
 0x1d3   :  { %v228_v27 = vadd.f32 %v226_v26, %v218_v25 }
 0x1d5   :  { %920 = vtanh.f32 %v228_v27 }
 0x1df   :  { %v921_v28 = vpop.eup %920 }
 0x1e0   :  { %231 = vrot.lane.b32.xlu1 %v921_v28, %s981_s28 }
 0x252   :  { %v232_v29 = vpop.permute.xlu1 %231 }
 0x253   :  { %v234_v30 = vmul.f32 %v919_v22, %v232_v29  ;;  %v122_v22 = vadd.f32 %v1061_v11, %v1056_v7 }
 0x255   :  { %v237_v31 = vpack.c.bf16 %v234_v30, %v234_v30 }
 0x257   :  { %239 = vrot.lane.b32.xlu1 %v237_v31, %s982_s3 }
 0x2c9   :  { %v240_v32 = vpop.permute.xlu1 %239 }
 0x2ca   :  { %850 = vmatmul.mubr.msk.bf16.vlgmr.msra.gmra.mrb[4].mxu1 %vm166_vm2, %v240_v32 }
 0x2cb   :  { %862 = vmatpush3.bf16.msra.mxu1 %v1023_v2  ;;  %865 = vmatprep.mubr.msk.bf16.mxu1 %vm979_vm0, %v978_v0 }
 0x2cc   :  { %863 = vmatprep.subr.bf16.mxu1 %v978_v0 }
 0x2cf   :  { %864 = vmatpush3.bf16.msra.mxu1 %v1037_v5 }
 0x2d0   :  { %877 = vmatprep.subr.bf16.mxu1 %v978_v0 }
 0x39d   :  { %v278_v34 = vpop.f32.mrb[4].mxu1 }
 0x39e   :  { %v284_v35 = vadd.f32 %v278_v34, %v114_v33  ;;  %v851_v36 = vpop.f32.mrb[5].mxu1 }
 0x39f   :  { %v281_v37 = vpop.f32.mrb[6].mxu1 }
 0x3a0   :  { %922 = vtanh.f32 %v284_v35  ;;  %v852_v38 = vpop.f32.mrb[7].mxu1  ;;  %v785_v40 = vmul.f32 -1.442695, %v284_v35 }
 0x3a2   :  { %924 = vpow2.f32 %v785_v40 }
 0x3aa   :  { %v923_v39 = vpop.eup %922 }
 0x3ab   :  { %294 = vrot.lane.b32.xlu0 %v923_v39, %s981_s28 }
 0x3ac   :  { %v925_v41 = vpop.eup %924 }
 0x3ad   :  { %v288_v42 = vadd.f32 1.0, %v925_v41 }
 0x3af   :  { %926 = vrcp.f32 %v288_v42  ;;  %v127_v42 = vadd.f32 %v1056_v7, %v1091_v56 }
 0x3b9   :  { %v927_v43 = vpop.eup %926 }
 0x3ba   :  { %v292_v46 = vmul.f32 %v927_v43, %v228_v27 }
 0x41d   :  { %v295_v44 = vpop.permute.xlu0 %294 }
 0x41e   :  { %v297_v45 = vmul.f32 %v927_v43, %v295_v44 }
 0x420   :  { %299 = vrot.lane.b32.xlu1 %v297_v45, %s982_s3 }
 0x492   :  { %v300_v47 = vpop.permute.xlu1 %299 }
 0x493   :  { %v302_v48 = vadd.f32 %v300_v47, %v292_v46 }
 0x495   :  { %928 = vtanh.f32 %v302_v48 }
 0x49f   :  { %v929_v51 = vpop.eup %928 }
 0x4a0   :  { %305 = vrot.lane.b32.xlu0 %v929_v51, %s981_s28 }
 0x512   :  { %v306_v52 = vpop.permute.xlu0 %305 }
 0x513   :  { %v308_v53 = vmul.f32 %v927_v43, %v306_v52 }
 0x515   :  { %v311_v54 = vpack.c.bf16 %v308_v53, %v308_v53 }
 0x517   :  { %313 = vrot.lane.b32.xlu1 %v311_v54, %s982_s3 }
 0x589   :  { %v314_v59 = vpop.permute.xlu1 %313 }
 0x58a   :  { %858 = vmatmul.mubr.msk.bf16.vlgmr.msra.gmra.mrb[8].mxu0 %vm166_vm2, %v314_v59 }
 0x58b   :  { %870 = vmatpush3.bf16.msra.mxu0 %v1023_v2  ;;  %873 = vmatprep.mubr.msk.bf16.mxu0 %vm979_vm0, %v978_v0 }
 0x58c   :  { %871 = vmatprep.subr.bf16.mxu0 %v978_v0 }
 0x58f   :  { %872 = vmatpush3.bf16.msra.mxu0 %v1037_v5 }
 0x590   :  { %885 = vmatprep.subr.bf16.mxu0 %v978_v0 }
 0x65d   :  { %v352_v61 = vpop.f32.mrb[8].mxu0 }
 0x65e   :  { %v358_v62 = vadd.f32 %v352_v61, %v119_v60  ;;  %v859_v63 = vpop.f32.mrb[9].mxu0 }
 0x65f   :  { %v355_v1 = vpop.f32.mrb[10].mxu0 }
 0x660   :  { %930 = vtanh.f32 %v358_v62  ;;  %v860_v3 = vpop.f32.mrb[11].mxu0  ;;  %v787_v6 = vmul.f32 -1.442695, %v358_v62 }
 0x662   :  { %932 = vpow2.f32 %v787_v6 }
 0x66a   :  { %v931_v4 = vpop.eup %930 }
 0x66b   :  { %368 = vrot.lane.b32.xlu0 %v931_v4, %s981_s28  ;;  %v130_v4 = vadd.f32 %v1056_v7, %v1095_v58 }
 0x66c   :  { %v933_v9 = vpop.eup %932 }
 0x66d   :  { %v362_v10 = vadd.f32 1.0, %v933_v9 }
 0x66f   :  { %934 = vrcp.f32 %v362_v10 }
 0x679   :  { %v935_v12 = vpop.eup %934 }
 0x67a   :  { %v366_v8 = vmul.f32 %v935_v12, %v302_v48 }
 0x6dd   :  { %v369_v13 = vpop.permute.xlu0 %368 }
 0x6de   :  { %v371_v14 = vmul.f32 %v935_v12, %v369_v13 }
 0x6e0   :  { %373 = vrot.lane.b32.xlu1 %v371_v14, %s982_s3 }
 0x752   :  { %v374_v15 = vpop.permute.xlu1 %373 }
 0x753   :  { %v376_v16 = vadd.f32 %v374_v15, %v366_v8 }
 0x755   :  { %936 = vtanh.f32 %v376_v16 }
 0x75f   :  { %v937_v17 = vpop.eup %936 }
 0x760   :  { %379 = vrot.lane.b32.xlu0 %v937_v17, %s981_s28 }
 0x7d2   :  { %v380_v18 = vpop.permute.xlu0 %379 }
 0x7d3   :  { %v382_v19 = vmul.f32 %v935_v12, %v380_v18 }
 0x7d5   :  { %v385_v20 = vpack.c.bf16 %v382_v19, %v382_v19 }
 0x7d7   :  { %387 = vrot.lane.b32.xlu1 %v385_v20, %s982_s3 }
 0x849   :  { %v388_v21 = vpop.permute.xlu1 %387 }
 0x84a   :  { %866 = vmatmul.mubr.msk.bf16.vlgmr.msra.gmra.mrb[8].mxu1 %vm166_vm2, %v388_v21 }
 0x84b   :  { %878 = vmatpush3.bf16.msra.mxu1 %v1023_v2  ;;  %881 = vmatprep.mubr.msk.bf16.mxu1 %vm979_vm0, %v978_v0 }
 0x84c   :  { %879 = vmatprep.subr.bf16.mxu1 %v978_v0 }
 0x84f   :  { %880 = vmatpush3.bf16.msra.mxu1 %v1037_v5 }
 0x850   :  { %893 = vmatprep.subr.bf16.mxu1 %v978_v0 }
 0x91d   :  { %v426_v23 = vpop.f32.mrb[8].mxu1 }
 0x91e   :  { %v432_v24 = vadd.f32 %v426_v23, %v122_v22  ;;  %v867_v25 = vpop.f32.mrb[9].mxu1 }
 0x91f   :  { %v429_v26 = vpop.f32.mrb[10].mxu1 }
 0x920   :  { %938 = vtanh.f32 %v432_v24  ;;  %v868_v27 = vpop.f32.mrb[11].mxu1  ;;  %v789_v29 = vmul.f32 -1.442695, %v432_v24  ;;  %v135_v24 = vadd.f32 %v1089_v55, %v1056_v7 }
 0x922   :  { %940 = vpow2.f32 %v789_v29 }
 0x92a   :  { %v939_v28 = vpop.eup %938 }
 0x92b   :  { %442 = vrot.lane.b32.xlu0 %v939_v28, %s981_s28 }
 0x92c   :  { %v941_v30 = vpop.eup %940 }
 0x92d   :  { %v436_v31 = vadd.f32 1.0, %v941_v30 }
 0x92f   :  { %942 = vrcp.f32 %v436_v31 }
 0x939   :  { %v943_v32 = vpop.eup %942 }
 0x93a   :  { %v440_v11 = vmul.f32 %v943_v32, %v376_v16 }
 0x99d   :  { %v443_v33 = vpop.permute.xlu0 %442 }
 0x99e   :  { %v445_v34 = vmul.f32 %v943_v32, %v443_v33 }
 0x9a0   :  { %447 = vrot.lane.b32.xlu1 %v445_v34, %s982_s3 }
 0xa12   :  { %v448_v35 = vpop.permute.xlu1 %447 }
 0xa13   :  { %v450_v36 = vadd.f32 %v448_v35, %v440_v11 }
 0xa15   :  { %944 = vtanh.f32 %v450_v36 }
 0xa1f   :  { %v945_v37 = vpop.eup %944 }
 0xa20   :  { %453 = vrot.lane.b32.xlu0 %v945_v37, %s981_s28 }
 0xa92   :  { %v454_v38 = vpop.permute.xlu0 %453 }
 0xa93   :  { %v456_v39 = vmul.f32 %v943_v32, %v454_v38 }
 0xa95   :  { %v459_v40 = vpack.c.bf16 %v456_v39, %v456_v39 }
 0xa97   :  { %461 = vrot.lane.b32.xlu1 %v459_v40, %s982_s3 }
 0xb09   :  { %v462_v41 = vpop.permute.xlu1 %461 }
 0xb0a   :  { %874 = vmatmul.mubr.msk.bf16.vlgmr.msra.gmra.mrb[12].mxu0 %vm166_vm2, %v462_v41 }
 0xb0b   :  { %886 = vmatpush3.bf16.msra.mxu0 %v1023_v2  ;;  %889 = vmatprep.mubr.msk.bf16.mxu0 %vm979_vm0, %v978_v0 }
 0xb0c   :  { %887 = vmatprep.subr.bf16.mxu0 %v978_v0 }
 0xb0f   :  { %888 = vmatpush3.bf16.msra.mxu0 %v1037_v5 }
 0xbdd   :  { %v500_v43 = vpop.f32.mrb[12].mxu0 }
 0xbde   :  { %v506_v44 = vadd.f32 %v500_v43, %v127_v42  ;;  %v875_v45 = vpop.f32.mrb[13].mxu0  ;;  %v138_v43 = vadd.f32 %v1093_v57, %v1056_v7 }
 0xbdf   :  { %v503_v46 = vpop.f32.mrb[14].mxu0 }
 0xbe0   :  { %946 = vtanh.f32 %v506_v44  ;;  %v876_v47 = vpop.f32.mrb[15].mxu0  ;;  %v791_v49 = vmul.f32 -1.442695, %v506_v44 }
 0xbe2   :  { %948 = vpow2.f32 %v791_v49 }
 0xbea   :  { %v947_v48 = vpop.eup %946 }
 0xbeb   :  { %516 = vrot.lane.b32.xlu0 %v947_v48, %s981_s28 }
 0xbec   :  { %v949_v50 = vpop.eup %948 }
 0xbed   :  { %v510_v51 = vadd.f32 1.0, %v949_v50 }
 0xbef   :  { %950 = vrcp.f32 %v510_v51 }
 0xbf9   :  { %v951_v52 = vpop.eup %950 }
 0xbfa   :  { %v514_v56 = vmul.f32 %v951_v52, %v450_v36 }
 0xc5d   :  { %v517_v53 = vpop.permute.xlu0 %516 }
 0xc5e   :  { %v519_v54 = vmul.f32 %v951_v52, %v517_v53 }
 0xc60   :  { %521 = vrot.lane.b32.xlu1 %v519_v54, %s982_s3 }
 0xcd2   :  { %v522_v59 = vpop.permute.xlu1 %521 }
 0xcd3   :  { %v524_v60 = vadd.f32 %v522_v59, %v514_v56 }
 0xcd5   :  { %952 = vtanh.f32 %v524_v60 }
 0xcdf   :  { %v953_v61 = vpop.eup %952 }
 0xce0   :  { %527 = vrot.lane.b32.xlu0 %v953_v61, %s981_s28 }
 0xd52   :  { %v528_v62 = vpop.permute.xlu0 %527 }
 0xd53   :  { %v530_v63 = vmul.f32 %v951_v52, %v528_v62 }
 0xd55   :  { %v533_v1 = vpack.c.bf16 %v530_v63, %v530_v63 }
 0xd57   :  { %535 = vrot.lane.b32.xlu1 %v533_v1, %s982_s3 }
 0xdc9   :  { %v536_v3 = vpop.permute.xlu1 %535 }
 0xdca   :  { %882 = vmatmul.mubr.msk.bf16.vlgmr.msra.gmra.mrb[12].mxu1 %vm166_vm2, %v536_v3 }
 0xdcb   :  { %894 = vmatpush3.bf16.msra.mxu1 %v1023_v2  ;;  %897 = vmatprep.mubr.msk.bf16.mxu1 %vm979_vm0, %v978_v0 }
 0xdcc   :  { %895 = vmatprep.subr.bf16.mxu1 %v978_v0 }
 0xdcf   :  { %896 = vmatpush3.bf16.msra.mxu1 %v1037_v5 }
 0xe9d   :  { %v574_v6 = vpop.f32.mrb[12].mxu1 }
 0xe9e   :  { %v580_v9 = vadd.f32 %v574_v6, %v130_v4  ;;  %v883_v10 = vpop.f32.mrb[13].mxu1 }
 0xe9f   :  { %v577_v12 = vpop.f32.mrb[14].mxu1 }
 0xea0   :  { %954 = vtanh.f32 %v580_v9  ;;  %v884_v13 = vpop.f32.mrb[15].mxu1  ;;  %v793_v2 = vmul.f32 -1.442695, %v580_v9 }
 0xea2   :  { %956 = vpow2.f32 %v793_v2 }
 0xeaa   :  { %v955_v14 = vpop.eup %954 }
 0xeab   :  { %590 = vrot.lane.b32.xlu0 %v955_v14, %s981_s28 }
 0xeac   :  { %v957_v8 = vpop.eup %956 }
 0xead   :  { %v584_v15 = vadd.f32 1.0, %v957_v8 }
 0xeaf   :  { %958 = vrcp.f32 %v584_v15 }
 0xeb9   :  { %v959_v0 = vpop.eup %958 }
 0xeba   :  { %v588_v58 = vmul.f32 %v959_v0, %v524_v60 }
 0xf1d   :  { %v591_v16 = vpop.permute.xlu0 %590 }
 0xf1e   :  { %v593_v5 = vmul.f32 %v959_v0, %v591_v16 }
 0xf20   :  { %595 = vrot.lane.b32.xlu1 %v593_v5, %s982_s3 }
 0xf92   :  { %v596_v17 = vpop.permute.xlu1 %595 }
 0xf93   :  { %v598_v18 = vadd.f32 %v596_v17, %v588_v58 }
 0xf95   :  { %960 = vtanh.f32 %v598_v18 }
 0xf9f   :  { %v961_v19 = vpop.eup %960 }
 0xfa0   :  { %601 = vrot.lane.b32.xlu0 %v961_v19, %s981_s28 }
0x1012   :  { %v602_v20 = vpop.permute.xlu0 %601 }
0x1013   :  { %v604_v21 = vmul.f32 %v959_v0, %v602_v20 }
0x1015   :  { %v607_v22 = vpack.c.bf16 %v604_v21, %v604_v21 }
0x1017   :  { %609 = vrot.lane.b32.xlu1 %v607_v22, %s982_s3 }
0x1089   :  { %v610_v23 = vpop.permute.xlu1 %609 }
0x108a   :  { %890 = vmatmul.mubr.msk.bf16.vlgmr.msra.gmra.mrb[16].mxu0 %vm166_vm2, %v610_v23 }
0x115d   :  { %v648_v25 = vpop.f32.mrb[16].mxu0 }
0x115e   :  { %v654_v26 = vadd.f32 %v648_v25, %v135_v24  ;;  %v891_v27 = vpop.f32.mrb[17].mxu0 }
0x115f   :  { %v651_v28 = vpop.f32.mrb[18].mxu0 }
0x1160   :  { %962 = vtanh.f32 %v654_v26  ;;  %v892_v29 = vpop.f32.mrb[19].mxu0  ;;  %v795_v31 = vmul.f32 -1.442695, %v654_v26 }
0x1162   :  { %964 = vpow2.f32 %v795_v31 }
0x116a   :  { %v963_v30 = vpop.eup %962 }
0x116b   :  { %664 = vrot.lane.b32.xlu0 %v963_v30, %s981_s28 }
0x116c   :  { %v965_v32 = vpop.eup %964 }
0x116d   :  { %v658_v33 = vadd.f32 1.0, %v965_v32 }
0x116f   :  { %966 = vrcp.f32 %v658_v33 }
0x1179   :  { %v967_v34 = vpop.eup %966 }
0x117a   :  { %v662_v55 = vmul.f32 %v967_v34, %v598_v18 }
0x11dd   :  { %v665_v11 = vpop.permute.xlu0 %664 }
0x11de   :  { %v667_v35 = vmul.f32 %v967_v34, %v665_v11 }
0x11e0   :  { %669 = vrot.lane.b32.xlu1 %v667_v35, %s982_s3 }
0x1252   :  { %v670_v36 = vpop.permute.xlu1 %669 }
0x1253   :  { %v672_v37 = vadd.f32 %v670_v36, %v662_v55 }
0x1255   :  { %968 = vtanh.f32 %v672_v37 }
0x125f   :  { %v969_v38 = vpop.eup %968 }
0x1260   :  { %675 = vrot.lane.b32.xlu0 %v969_v38, %s981_s28 }
0x12d2   :  { %v676_v39 = vpop.permute.xlu0 %675 }
0x12d3   :  { %v678_v40 = vmul.f32 %v967_v34, %v676_v39 }
0x12d5   :  { %v681_v41 = vpack.c.bf16 %v678_v40, %v678_v40 }
0x12d7   :  { %683 = vrot.lane.b32.xlu1 %v681_v41, %s982_s3 }
0x1349   :  { %v684_v42 = vpop.permute.xlu1 %683 }
0x134a   :  { %898 = vmatmul.mubr.msk.bf16.vlgmr.msra.gmra.mrb[16].mxu1 %vm166_vm2, %v684_v42 }
0x141d   :  { %v722_v44 = vpop.f32.mrb[16].mxu1 }
0x141e   :  { %v728_v45 = vadd.f32 %v722_v44, %v138_v43  ;;  %v899_v46 = vpop.f32.mrb[17].mxu1 }
0x141f   :  { %v725_v47 = vpop.f32.mrb[18].mxu1 }
0x1420   :  { %970 = vtanh.f32 %v728_v45  ;;  %v900_v48 = vpop.f32.mrb[19].mxu1  ;;  %v797_v50 = vmul.f32 -1.442695, %v728_v45 }
0x1422   :  { %972 = vpow2.f32 %v797_v50 }
0x142a   :  { %v971_v49 = vpop.eup %970 }
0x142b   :  { %738 = vrot.lane.b32.xlu0 %v971_v49, %s981_s28 }
0x142c   :  { %v973_v51 = vpop.eup %972 }
0x142d   :  { %v732_v52 = vadd.f32 1.0, %v973_v51 }
0x142f   :  { %974 = vrcp.f32 %v732_v52 }
0x1439   :  { %v975_v53 = vpop.eup %974 }
0x143a   :  { %v736_v7 = vmul.f32 %v975_v53, %v672_v37 }
0x149d   :  { %v739_v54 = vpop.permute.xlu0 %738 }
0x149e   :  { %v741_v56 = vmul.f32 %v975_v53, %v739_v54 }
0x14a0   :  { %743 = vrot.lane.b32.xlu1 %v741_v56, %s982_s3 }
0x1512   :  { %v744_v57 = vpop.permute.xlu1 %743 }
0x1513   :  { %v746_v59 = vadd.f32 %v744_v57, %v736_v7 }
0x1515   :  { %976 = vtanh.f32 %v746_v59 }
0x151f   :  { %v977_v60 = vpop.eup %976 }
0x1520   :  { %749 = vrot.lane.b32.xlu0 %v977_v60, %s981_s28 }
0x1524   :  { %759 = vrot.lane.b32.xlu0 %v746_v59, %s983_s0 }
0x1592   :  { %v750_v61 = vpop.permute.xlu0 %749 }
0x1593   :  { %v752_v62 = vmul.f32 %v975_v53, %v750_v61 }
0x1595   :  { %754 = vrot.lane.b32.xlu1 %v752_v62, %s982_s3 }
0x1596   :  { %v760_v63 = vpop.permute.xlu0 %759 }
0x1597   :  { %762 = vst.msk [vmem:[%s1173_s5] sm:$0xff] %vm166_vm2, %v760_v63 }
0x1607   :  { %v755_v1 = vpop.permute.xlu1 %754 }
0x1608   :  { %757 = vst.msk [vmem:[%s1174_s4] sm:$0xff] %vm166_vm2, %v755_v1 }

</bundles_post_ra>
